<compile_context>
chip_gen: v5e
topology: v5e:2x2
jax: 0.10.0
libtpu: 0.0.40
codegen_flags: <defaults>
</compile_context>

<pallas_src>
import jax
import jax.numpy as jnp
from jax import lax
from jax.experimental import pallas as pl
from jax.experimental.pallas import tpu as pltpu


_BN_EPS = 1e-5
_VMEM_LIMIT_BYTES = 48 * 1024 * 1024   # <= v7x 64 MiB physical; fine on v5e/v6e


def _pick_lane_tile(total, target):
    """Largest multiple-of-128 divisor of `total` that is <= target, falling back
    to the full extent (always a legal block dim)."""
    if total <= target:
        return total
    t = (target // 128) * 128
    while t >= 128:
        if total % t == 0:
            return t
        t -= 128
    # TODO(synk): no multiple-of-128 divisor -> single full-extent tile; a cdiv
    # grid with a masked tail would keep tiles small for such N.
    return total


# --------------------------------------------------------------------------- #
# Layer 0: 3-NN inverse-distance interpolation + (optional points1 concat)
#          + Conv1d(k=1)  + per-tile BN partial stats.   Grid = (B, N//tn).
# --------------------------------------------------------------------------- #
def _make_layer0_kernel(S, has_p1):
    def kernel(*refs):
        if has_p1:
            (xyz1_ref, xyz2t_ref, p2_ref, p1_ref,
             wa_ref, wb_ref, b_ref, y_ref, s1_ref, s2_ref) = refs
        else:
            (xyz1_ref, xyz2t_ref, p2_ref,
             wb_ref, b_ref, y_ref, s1_ref, s2_ref) = refs

        p2 = p2_ref[0]                       # [D2, S]   (native points2 layout)
        wb = wb_ref[...]                     # [C0, D2]
        tn = y_ref.shape[-1]

        if S == 1:
            # points2.repeat(1, N, 1) in channel-major form: broadcast along N.
            interp = jnp.broadcast_to(p2, (p2.shape[0], tn))          # [D2, tn]
        else:
            x1 = xyz1_ref[0]                 # [3, tn]   (native xyz1 layout)
            x2t = xyz2t_ref[0]               # [S, 3]
            # Squared distance WITHOUT the per-column ||x1||^2 constant:
            # argmin over S is invariant to it; it is added back before 1/d.
            sq2 = jnp.sum(x2t * x2t, axis=1, keepdims=True)           # [S, 1]
            d = sq2 - 2.0 * jnp.dot(x2t, x1,
                                    preferred_element_type=jnp.float32)  # [S, tn]
            sq1 = jnp.sum(x1 * x1, axis=0, keepdims=True)             # [1, tn]
            iota = lax.broadcasted_iota(jnp.int32, (S, 1), 0)         # [S, 1]

            # Top-3 smallest distances via iterative masked-min selection
            # (== dists.sort()[..., :3]; ties resolved to the lowest index).
            dd = d
            wacc = jnp.zeros_like(d)         # sparse (3 nnz / column) weights
            wsum = jnp.zeros((1, tn), jnp.float32)
            for _ in range(3):
                m = jnp.min(dd, axis=0, keepdims=True)                # [1, tn]
                idx = jnp.min(jnp.where(dd == m, iota, S),
                              axis=0, keepdims=True)                  # [1, tn]
                onehot = iota == idx                                  # [S, tn]
                w = 1.0 / jnp.maximum(m + sq1, 1e-10)   # dists<1e-10 -> 1e-10; 1/d
                wacc = wacc + jnp.where(onehot, w, 0.0)
                wsum = wsum + w
                dd = jnp.where(onehot, jnp.inf, dd)

            # sum(index_points(points2, idx) * weight) == sparse-weight matmul.
            interp = jnp.dot(p2, wacc,
                             preferred_element_type=jnp.float32)      # [D2, tn]
            # Normalisation reciprocal on the EUP slot + one Newton step.
            r = pl.reciprocal(wsum, approx=True)
            r = r * (2.0 - wsum * r)
            interp = interp * r

        # Layer-0 conv: concat([points1, interp]) @ W == split-weight matmuls.
        y = jnp.dot(wb, interp.astype(wb.dtype),
                    preferred_element_type=jnp.float32)               # [C0, tn]
        if has_p1:
            wa = wa_ref[...]                 # [C0, D1]
            p1 = p1_ref[0]                   # [D1, tn]  (native points1 layout)
            y = y + jnp.dot(wa, p1.astype(wa.dtype),
                            preferred_element_type=jnp.float32)
        y = y + b_ref[...]

        y_ref[0] = y
        # Per-tile BN partial stats (combined in plain JAX) -> grid stays parallel.
        s1_ref[0, 0] = jnp.sum(y, axis=1, keepdims=True)
        s2_ref[0, 0] = jnp.sum(y * y, axis=1, keepdims=True)
    return kernel


def _layer0(xyz1, xyz2t, points2, points1, w0, b0, tn):
    B, C3, N = xyz1.shape
    S = xyz2t.shape[1]
    D2 = points2.shape[1]
    C0 = w0.shape[0]
    ntn = N // tn
    has_p1 = points1 is not None

    kernel = _make_layer0_kernel(S, has_p1)

    xyz1_spec = pl.BlockSpec((1, C3, tn), lambda b, n: (b, 0, n))
    xyz2t_spec = pl.BlockSpec((1, S, C3), lambda b, n: (b, 0, 0))      # resident over n
    p2_spec = pl.BlockSpec((1, D2, S), lambda b, n: (b, 0, 0))         # resident over n
    bias_spec = pl.BlockSpec(b0.shape, lambda b, n: (0, 0))

    if has_p1:
        D1 = points1.shape[1]
        wa, wb = w0[:, :D1], w0[:, D1:]
        args = (xyz1, xyz2t, points2, points1, wa, wb, b0)
        in_specs = [xyz1_spec, xyz2t_spec, p2_spec,
                    pl.BlockSpec((1, D1, tn), lambda b, n: (b, 0, n)),
                    pl.BlockSpec(wa.shape, lambda b, n: (0, 0)),
                    pl.BlockSpec(wb.shape, lambda b, n: (0, 0)),
                    bias_spec]
    else:
        args = (xyz1, xyz2t, points2, w0, b0)
        in_specs = [xyz1_spec, xyz2t_spec, p2_spec,
                    pl.BlockSpec(w0.shape, lambda b, n: (0, 0)),
                    bias_spec]

    return pl.pallas_call(
        kernel,
        grid=(B, ntn),
        out_shape=(jax.ShapeDtypeStruct((B, C0, N), jnp.float32),
                   jax.ShapeDtypeStruct((B, ntn, C0, 1), jnp.float32),
                   jax.ShapeDtypeStruct((B, ntn, C0, 1), jnp.float32)),
        in_specs=in_specs,
        out_specs=(pl.BlockSpec((1, C0, tn), lambda b, n: (b, 0, n)),
                   pl.BlockSpec((1, 1, C0, 1), lambda b, n: (b, n, 0, 0)),
                   pl.BlockSpec((1, 1, C0, 1), lambda b, n: (b, n, 0, 0))),
        compiler_params=pltpu.CompilerParams(
            dimension_semantics=("parallel", "parallel"),
            vmem_limit_bytes=_VMEM_LIMIT_BYTES),
    )(*args)


# --------------------------------------------------------------------------- #
# Middle layers: previous layer's BN + ReLU fused into this layer's Conv1d
# matmul, plus per-tile BN partial stats.   Grid = (B, N//tn).
# --------------------------------------------------------------------------- #
def _mid_kernel(x_ref, scale_ref, shift_ref, w_ref, b_ref, y_ref, s1_ref, s2_ref):
    a = jnp.maximum(x_ref[0] * scale_ref[...] + shift_ref[...], 0.0)   # [Cin, tn]
    w = w_ref[...]                                                     # [Cout, Cin]
    y = jnp.dot(w, a.astype(w.dtype),
                preferred_element_type=jnp.float32) + b_ref[...]       # [Cout, tn]
    y_ref[0] = y
    s1_ref[0, 0] = jnp.sum(y, axis=1, keepdims=True)
    s2_ref[0, 0] = jnp.sum(y * y, axis=1, keepdims=True)


def _mid_layer(x, scale, shift, w, b, tn):
    B, Cin, N = x.shape
    Cout = w.shape[0]
    ntn = N // tn
    return pl.pallas_call(
        _mid_kernel,
        grid=(B, ntn),
        out_shape=(jax.ShapeDtypeStruct((B, Cout, N), jnp.float32),
                   jax.ShapeDtypeStruct((B, ntn, Cout, 1), jnp.float32),
                   jax.ShapeDtypeStruct((B, ntn, Cout, 1), jnp.float32)),
        in_specs=[pl.BlockSpec((1, Cin, tn), lambda b, n: (b, 0, n)),
                  pl.BlockSpec(scale.shape, lambda b, n: (0, 0)),
                  pl.BlockSpec(shift.shape, lambda b, n: (0, 0)),
                  pl.BlockSpec(w.shape, lambda b, n: (0, 0)),
                  pl.BlockSpec(b.shape, lambda b, n: (0, 0))],
        out_specs=(pl.BlockSpec((1, Cout, tn), lambda b, n: (b, 0, n)),
                   pl.BlockSpec((1, 1, Cout, 1), lambda b, n: (b, n, 0, 0)),
                   pl.BlockSpec((1, 1, Cout, 1), lambda b, n: (b, n, 0, 0))),
        compiler_params=pltpu.CompilerParams(
            dimension_semantics=("parallel", "parallel"),
            vmem_limit_bytes=_VMEM_LIMIT_BYTES),
    )(x, scale, shift, w, b)


# --------------------------------------------------------------------------- #
# Final BN + ReLU (output is already in the required [B, C_last, N] layout).
# --------------------------------------------------------------------------- #
def _final_kernel(x_ref, scale_ref, shift_ref, o_ref):
    o_ref[0] = jnp.maximum(x_ref[0] * scale_ref[...] + shift_ref[...], 0.0)


def _final_bnrelu(x, scale, shift, tn):
    B, C, N = x.shape
    return pl.pallas_call(
        _final_kernel,
        grid=(B, N // tn),
        out_shape=jax.ShapeDtypeStruct((B, C, N), jnp.float32),
        in_specs=[pl.BlockSpec((1, C, tn), lambda b, n: (b, 0, n)),
                  pl.BlockSpec(scale.shape, lambda b, n: (0, 0)),
                  pl.BlockSpec(shift.shape, lambda b, n: (0, 0))],
        out_specs=pl.BlockSpec((1, C, tn), lambda b, n: (b, 0, n)),
        compiler_params=pltpu.CompilerParams(
            dimension_semantics=("parallel", "parallel"),
            vmem_limit_bytes=_VMEM_LIMIT_BYTES),
    )(x, scale, shift)


def _bn_affine(s1, s2, gamma, beta, count):
    """Fold training-mode BatchNorm (biased variance) + affine into scale/shift.
    s1/s2 are [B, ntiles, C, 1] per-tile partial sums; combining them here is a
    tiny JAX reduction (keeps every Pallas grid axis 'parallel')."""
    mean = jnp.sum(s1, axis=(0, 1)) / count                    # [C, 1]
    var = jnp.maximum(jnp.sum(s2, axis=(0, 1)) / count - mean * mean, 0.0)
    scale = gamma * lax.rsqrt(var + _BN_EPS)
    shift = beta - mean * scale
    return scale, shift


# --------------------------------------------------------------------------- #
# Full forward.
# --------------------------------------------------------------------------- #
def pointnet_feature_propagation(xyz1, xyz2, points1, points2, params,
                                 *, compute_dtype=jnp.float32, tn_target=1024):
    """
    xyz1: [B, 3, N], xyz2: [B, 3, S], points1: [B, D1, N] or None, points2: [B, D2, S]
    params: list of (w [Cout, Cin], bias [Cout, 1], gamma [Cout, 1], beta [Cout, 1])
    returns: [B, mlp[-1], N]
    compute_dtype=jnp.bfloat16 uses bf16 MXU operands (f32 accumulate) on v6e/v7x.
    """
    B, _, N = xyz1.shape
    S = xyz2.shape[-1]
    if 1 < S < 3:
        raise ValueError("3-NN interpolation requires S >= 3 (or S == 1), like the reference.")

    tn = _pick_lane_tile(N, tn_target)
    count = float(B * N)

    # Only remaining wrapper permute: xyz2 -> [B, S, 3]  (3*S floats per batch).
    xyz2t = jnp.transpose(xyz2, (0, 2, 1))

    # Layer 0: interpolation + concat + Conv1d fused in one kernel.
    w0, b0, g0, be0 = params[0]
    y, s1, s2 = _layer0(xyz1, xyz2t, points2, points1,
                        w0.astype(compute_dtype), b0, tn)
    scale, shift = _bn_affine(s1, s2, g0, be0, count)

    # Middle layers: previous BN+ReLU fused into this layer's matmul.
    for (w, b, g, be) in params[1:]:
        y, s1, s2 = _mid_layer(y, scale, shift, w.astype(compute_dtype), b, tn)
        scale, shift = _bn_affine(s1, s2, g, be, count)

    # Final BN + ReLU; output is already [B, C_last, N].
    return _final_bnrelu(y, scale, shift, tn)


def init_params(in_channel, mlp, key):
    """Deterministic synthetic Conv1d / BatchNorm1d parameters (PyTorch-native layouts)."""
    params = []
    last = in_channel
    for out_c in mlp:
        key, k1, k2 = jax.random.split(key, 3)
        bound = 1.0 / (last ** 0.5)
        w = jax.random.uniform(k1, (out_c, last), jnp.float32, -bound, bound)  # Conv1d weight [O, I, 1]
        b = jax.random.uniform(k2, (out_c, 1), jnp.float32, -bound, bound)     # Conv1d bias
        gamma = jnp.ones((out_c, 1), jnp.float32)                              # BN weight (default init)
        beta = jnp.zeros((out_c, 1), jnp.float32)                              # BN bias   (default init)
        params.append((w, b, gamma, beta))
        last = out_c
    return params


# --------------------------------------------------------------------------- #
# Pure-JAX reference (mirrors the PyTorch forward, BN in training mode).
# --------------------------------------------------------------------------- #
def _reference(xyz1, xyz2, points1, points2, params):
    B, _, N = xyz1.shape
    S = xyz2.shape[-1]
    x1 = jnp.transpose(xyz1, (0, 2, 1))
    x2 = jnp.transpose(xyz2, (0, 2, 1))
    p2 = jnp.transpose(points2, (0, 2, 1))
    if S == 1:
        interp = jnp.broadcast_to(p2, (B, N, p2.shape[-1]))
    else:
        d = (jnp.sum(x1 ** 2, -1)[:, :, None]
             - 2.0 * jnp.einsum('bnc,bsc->bns', x1, x2)
             + jnp.sum(x2 ** 2, -1)[:, None, :])
        neg_vals, idx = lax.top_k(-d, 3)
        dists = jnp.maximum(-neg_vals, 1e-10)
        w = 1.0 / dists
        w = w / jnp.sum(w, -1, keepdims=True)
        gathered = jax.vmap(lambda pts, ind: pts[ind])(p2, idx)        # [B, N, 3, D2]
        interp = jnp.sum(gathered * w[..., None], axis=2)              # [B, N, D2]
    if points1 is not None:
        new = jnp.concatenate([jnp.transpose(points1, (0, 2, 1)), interp], axis=-1)
    else:
        new = interp
    x = jnp.transpose(new, (0, 2, 1))                                  # [B, Cin, N]
    for (w, b, g, be) in params:
        y = jnp.einsum('oi,bin->bon', w, x) + b[None]
        mean = jnp.mean(y, axis=(0, 2), keepdims=True)
        var = jnp.mean((y - mean) ** 2, axis=(0, 2), keepdims=True)
        y = (y - mean) * lax.rsqrt(var + _BN_EPS) * g[None] + be[None]
        x = jnp.maximum(y, 0.0)
    return x


if __name__ == "__main__":
    key = jax.random.PRNGKey(0)
    kx1, kx2, kp1, kp2, kw = jax.random.split(key, 5)

    B, C, N, S = 2, 3, 256, 16
    D1, D2 = 8, 16
    mlp = [32, 16]
    in_channel = D1 + D2

    xyz1 = jax.random.normal(kx1, (B, C, N), jnp.float32)
    xyz2 = jax.random.normal(kx2, (B, C, S), jnp.float32)
    points1 = jax.random.normal(kp1, (B, D1, N), jnp.float32)
    points2 = jax.random.normal(kp2, (B, D2, S), jnp.float32)

    params = init_params(in_channel, mlp, kw)

    out = pointnet_feature_propagation(xyz1, xyz2, points1, points2, params)
    out = jax.block_until_ready(out)
    assert out.shape == (B, mlp[-1], N), out.shape
    assert bool(jnp.all(jnp.isfinite(out)))

    ref = _reference(xyz1, xyz2, points1, points2, params)
    err = float(jnp.max(jnp.abs(out - ref)))
    assert err < 3e-2, f"max abs error vs reference: {err}"

    print("KERNEL_OK")
</pallas_src>

<mosaic_0001>
module attributes {stable_mosaic.version = 11 : i64} {
  func.func @kernel(%arg0: i32, %arg1: i32, %arg2: memref<1x3x256xf32, #tpu.memory_space<vmem>>, %arg3: memref<1x16x3xf32, #tpu.memory_space<vmem>>, %arg4: memref<1x16x16xf32, #tpu.memory_space<vmem>>, %arg5: memref<1x8x256xf32, #tpu.memory_space<vmem>>, %arg6: memref<32x8xf32, #tpu.memory_space<vmem>>, %arg7: memref<32x16xf32, #tpu.memory_space<vmem>>, %arg8: memref<32x1xf32, #tpu.memory_space<vmem>>, %arg9: memref<1x32x256xf32, #tpu.memory_space<vmem>>, %arg10: memref<1x1x32x1xf32, #tpu.memory_space<vmem>>, %arg11: memref<1x1x32x1xf32, #tpu.memory_space<vmem>>) attributes {dimension_semantics = [#tpu.dimension_semantics<parallel>, #tpu.dimension_semantics<parallel>], iteration_bounds = array<i64: 2, 1>, scalar_prefetch = 0 : i64, scratch_operands = 0 : i64, tpu.core_type = #tpu.core_type<tc>, window_params = [{transform_indices = @transform_0, window_bounds = array<i64: 1, 3, 256>}, {transform_indices = @transform_1, window_bounds = array<i64: 1, 16, 3>}, {transform_indices = @transform_2, window_bounds = array<i64: 1, 16, 16>}, {transform_indices = @transform_3, window_bounds = array<i64: 1, 8, 256>}, {pipeline_mode = #tpu.pipeline_mode<synchronous>, transform_indices = @transform_4, window_bounds = array<i64: 32, 8>}, {pipeline_mode = #tpu.pipeline_mode<synchronous>, transform_indices = @transform_5, window_bounds = array<i64: 32, 16>}, {pipeline_mode = #tpu.pipeline_mode<synchronous>, transform_indices = @transform_6, window_bounds = array<i64: 32, 1>}, {transform_indices = @transform_7, window_bounds = array<i64: 1, 32, 256>}, {transform_indices = @transform_8, window_bounds = array<i64: 1, 1, 32, 1>}, {transform_indices = @transform_9, window_bounds = array<i64: 1, 1, 32, 1>}]} {
    %c0 = arith.constant 0 : index
    %c0_0 = arith.constant 0 : index
    %c0_1 = arith.constant 0 : index
    %0 = vector.load %arg4[%c0, %c0_0, %c0_1] : memref<1x16x16xf32, #tpu.memory_space<vmem>>, vector<1x16x16xf32>
    %1 = vector.shape_cast %0 : vector<1x16x16xf32> to vector<16x16xf32>
    %c0_2 = arith.constant 0 : index
    %c0_3 = arith.constant 0 : index
    %2 = vector.load %arg7[%c0_2, %c0_3] : memref<32x16xf32, #tpu.memory_space<vmem>>, vector<32x16xf32>
    %c0_4 = arith.constant 0 : index
    %c0_5 = arith.constant 0 : index
    %c0_6 = arith.constant 0 : index
    %3 = vector.load %arg2[%c0_4, %c0_5, %c0_6] : memref<1x3x256xf32, #tpu.memory_space<vmem>>, vector<1x3x256xf32>
    %4 = vector.shape_cast %3 : vector<1x3x256xf32> to vector<3x256xf32>
    %c0_7 = arith.constant 0 : index
    %c0_8 = arith.constant 0 : index
    %c0_9 = arith.constant 0 : index
    %5 = vector.load %arg3[%c0_7, %c0_8, %c0_9] : memref<1x16x3xf32, #tpu.memory_space<vmem>>, vector<1x16x3xf32>
    %6 = vector.shape_cast %5 : vector<1x16x3xf32> to vector<16x3xf32>
    %7 = arith.mulf %6, %6 : vector<16x3xf32>
    %cst = arith.constant dense<0.000000e+00> : vector<16xf32>
    %8 = vector.multi_reduction <add>, %7, %cst [1] : vector<16x3xf32> to vector<16xf32>
    %9 = vector.shape_cast %8 : vector<16xf32> to vector<16x1xf32>
    %cst_10 = arith.constant dense<0.000000e+00> : vector<16x256xf32>
    %10 = tpu.matmul %6, %4, %cst_10 {dimension_numbers = #tpu.dot_dimension_numbers<[1], [0], [0], [1], [0, 0, 1, 1], [], []>} : vector<16x3xf32>, vector<3x256xf32>, vector<16x256xf32> -> vector<16x256xf32>
    %cst_11 = arith.constant 2.000000e+00 : f32
    %11 = vector.broadcast %cst_11 : f32 to vector<16x256xf32>
    %12 = arith.mulf %11, %10 : vector<16x256xf32>
    %13 = vector.broadcast %9 : vector<16x1xf32> to vector<16x256xf32>
    %14 = arith.subf %13, %12 : vector<16x256xf32>
    %15 = arith.mulf %4, %4 : vector<3x256xf32>
    %cst_12 = arith.constant dense<0.000000e+00> : vector<256xf32>
    %16 = vector.multi_reduction <add>, %15, %cst_12 [0] : vector<3x256xf32> to vector<256xf32>
    %17 = vector.shape_cast %16 : vector<256xf32> to vector<1x256xf32>
    %18 = tpu.iota {dimensions = array<i32: 0>} : vector<16x1xi32>
    %cst_13 = arith.constant 0.000000e+00 : f32
    %19 = vector.broadcast %cst_13 : f32 to vector<16x256xf32>
    %cst_14 = arith.constant 0.000000e+00 : f32
    %20 = vector.broadcast %cst_14 : f32 to vector<1x256xf32>
    %cst_15 = arith.constant dense<0x7F800000> : vector<256xf32>
    %21 = vector.multi_reduction <minimumf>, %14, %cst_15 [0] : vector<16x256xf32> to vector<256xf32>
    %22 = vector.shape_cast %21 : vector<256xf32> to vector<1x256xf32>
    %23 = vector.broadcast %22 : vector<1x256xf32> to vector<16x256xf32>
    %24 = arith.cmpf oeq, %14, %23 : vector<16x256xf32>
    %c16_i32 = arith.constant 16 : i32
    %25 = vector.shape_cast %18 : vector<16x1xi32> to vector<16x1xi32>
    %26 = vector.broadcast %25 : vector<16x1xi32> to vector<16x256xi32>
    %27 = vector.broadcast %c16_i32 : i32 to vector<16x256xi32>
    %28 = arith.select %24, %26, %27 : vector<16x256xi1>, vector<16x256xi32>
    %cst_16 = arith.constant dense<2147483647> : vector<256xi32>
    %29 = vector.multi_reduction <minsi>, %28, %cst_16 [0] : vector<16x256xi32> to vector<256xi32>
    %30 = vector.shape_cast %29 : vector<256xi32> to vector<1x256xi32>
    %31 = vector.broadcast %18 : vector<16x1xi32> to vector<16x256xi32>
    %32 = vector.broadcast %30 : vector<1x256xi32> to vector<16x256xi32>
    %33 = arith.cmpi eq, %31, %32 : vector<16x256xi32>
    %34 = arith.addf %22, %17 : vector<1x256xf32>
    %cst_17 = arith.constant 1.000000e-10 : f32
    %35 = vector.broadcast %cst_17 : f32 to vector<1x256xf32>
    %36 = arith.maximumf %34, %35 : vector<1x256xf32>
    %cst_18 = arith.constant 1.000000e+00 : f32
    %37 = vector.broadcast %cst_18 : f32 to vector<1x256xf32>
    %38 = arith.divf %37, %36 : vector<1x256xf32>
    %cst_19 = arith.constant 0.000000e+00 : f32
    %39 = vector.shape_cast %38 : vector<1x256xf32> to vector<1x256xf32>
    %40 = vector.broadcast %39 : vector<1x256xf32> to vector<16x256xf32>
    %41 = vector.broadcast %cst_19 : f32 to vector<16x256xf32>
    %42 = arith.select %33, %40, %41 : vector<16x256xi1>, vector<16x256xf32>
    %43 = arith.addf %19, %42 : vector<16x256xf32>
    %44 = arith.addf %20, %38 : vector<1x256xf32>
    %cst_20 = arith.constant 0x7F800000 : f32
    %45 = vector.broadcast %cst_20 : f32 to vector<16x256xf32>
    %46 = arith.select %33, %45, %14 : vector<16x256xi1>, vector<16x256xf32>
    %cst_21 = arith.constant dense<0x7F800000> : vector<256xf32>
    %47 = vector.multi_reduction <minimumf>, %46, %cst_21 [0] : vector<16x256xf32> to vector<256xf32>
    %48 = vector.shape_cast %47 : vector<256xf32> to vector<1x256xf32>
    %49 = vector.broadcast %48 : vector<1x256xf32> to vector<16x256xf32>
    %50 = arith.cmpf oeq, %46, %49 : vector<16x256xf32>
    %c16_i32_22 = arith.constant 16 : i32
    %51 = vector.shape_cast %18 : vector<16x1xi32> to vector<16x1xi32>
    %52 = vector.broadcast %51 : vector<16x1xi32> to vector<16x256xi32>
    %53 = vector.broadcast %c16_i32_22 : i32 to vector<16x256xi32>
    %54 = arith.select %50, %52, %53 : vector<16x256xi1>, vector<16x256xi32>
    %cst_23 = arith.constant dense<2147483647> : vector<256xi32>
    %55 = vector.multi_reduction <minsi>, %54, %cst_23 [0] : vector<16x256xi32> to vector<256xi32>
    %56 = vector.shape_cast %55 : vector<256xi32> to vector<1x256xi32>
    %57 = vector.broadcast %18 : vector<16x1xi32> to vector<16x256xi32>
    %58 = vector.broadcast %56 : vector<1x256xi32> to vector<16x256xi32>
    %59 = arith.cmpi eq, %57, %58 : vector<16x256xi32>
    %60 = arith.addf %48, %17 : vector<1x256xf32>
    %cst_24 = arith.constant 1.000000e-10 : f32
    %61 = vector.broadcast %cst_24 : f32 to vector<1x256xf32>
    %62 = arith.maximumf %60, %61 : vector<1x256xf32>
    %cst_25 = arith.constant 1.000000e+00 : f32
    %63 = vector.broadcast %cst_25 : f32 to vector<1x256xf32>
    %64 = arith.divf %63, %62 : vector<1x256xf32>
    %cst_26 = arith.constant 0.000000e+00 : f32
    %65 = vector.shape_cast %64 : vector<1x256xf32> to vector<1x256xf32>
    %66 = vector.broadcast %65 : vector<1x256xf32> to vector<16x256xf32>
    %67 = vector.broadcast %cst_26 : f32 to vector<16x256xf32>
    %68 = arith.select %59, %66, %67 : vector<16x256xi1>, vector<16x256xf32>
    %69 = arith.addf %43, %68 : vector<16x256xf32>
    %70 = arith.addf %44, %64 : vector<1x256xf32>
    %cst_27 = arith.constant 0x7F800000 : f32
    %71 = vector.broadcast %cst_27 : f32 to vector<16x256xf32>
    %72 = arith.select %59, %71, %46 : vector<16x256xi1>, vector<16x256xf32>
    %cst_28 = arith.constant dense<0x7F800000> : vector<256xf32>
    %73 = vector.multi_reduction <minimumf>, %72, %cst_28 [0] : vector<16x256xf32> to vector<256xf32>
    %74 = vector.shape_cast %73 : vector<256xf32> to vector<1x256xf32>
    %75 = vector.broadcast %74 : vector<1x256xf32> to vector<16x256xf32>
    %76 = arith.cmpf oeq, %72, %75 : vector<16x256xf32>
    %c16_i32_29 = arith.constant 16 : i32
    %77 = vector.shape_cast %18 : vector<16x1xi32> to vector<16x1xi32>
    %78 = vector.broadcast %77 : vector<16x1xi32> to vector<16x256xi32>
    %79 = vector.broadcast %c16_i32_29 : i32 to vector<16x256xi32>
    %80 = arith.select %76, %78, %79 : vector<16x256xi1>, vector<16x256xi32>
    %cst_30 = arith.constant dense<2147483647> : vector<256xi32>
    %81 = vector.multi_reduction <minsi>, %80, %cst_30 [0] : vector<16x256xi32> to vector<256xi32>
    %82 = vector.shape_cast %81 : vector<256xi32> to vector<1x256xi32>
    %83 = vector.broadcast %18 : vector<16x1xi32> to vector<16x256xi32>
    %84 = vector.broadcast %82 : vector<1x256xi32> to vector<16x256xi32>
    %85 = arith.cmpi eq, %83, %84 : vector<16x256xi32>
    %86 = arith.addf %74, %17 : vector<1x256xf32>
    %cst_31 = arith.constant 1.000000e-10 : f32
    %87 = vector.broadcast %cst_31 : f32 to vector<1x256xf32>
    %88 = arith.maximumf %86, %87 : vector<1x256xf32>
    %cst_32 = arith.constant 1.000000e+00 : f32
    %89 = vector.broadcast %cst_32 : f32 to vector<1x256xf32>
    %90 = arith.divf %89, %88 : vector<1x256xf32>
    %cst_33 = arith.constant 0.000000e+00 : f32
    %91 = vector.shape_cast %90 : vector<1x256xf32> to vector<1x256xf32>
    %92 = vector.broadcast %91 : vector<1x256xf32> to vector<16x256xf32>
    %93 = vector.broadcast %cst_33 : f32 to vector<16x256xf32>
    %94 = arith.select %85, %92, %93 : vector<16x256xi1>, vector<16x256xf32>
    %95 = arith.addf %69, %94 : vector<16x256xf32>
    %96 = arith.addf %70, %90 : vector<1x256xf32>
    %cst_34 = arith.constant dense<0.000000e+00> : vector<16x256xf32>
    %97 = tpu.matmul %1, %95, %cst_34 {dimension_numbers = #tpu.dot_dimension_numbers<[1], [0], [0], [1], [0, 0, 1, 1], [], []>} : vector<16x16xf32>, vector<16x256xf32>, vector<16x256xf32> -> vector<16x256xf32>
    %98 = tpu.reciprocal %96 {approx = true} : vector<1x256xf32> -> vector<1x256xf32>
    %99 = arith.mulf %96, %98 : vector<1x256xf32>
    %cst_35 = arith.constant 2.000000e+00 : f32
    %100 = vector.broadcast %cst_35 : f32 to vector<1x256xf32>
    %101 = arith.subf %100, %99 : vector<1x256xf32>
    %102 = arith.mulf %98, %101 : vector<1x256xf32>
    %103 = vector.broadcast %102 : vector<1x256xf32> to vector<16x256xf32>
    %104 = arith.mulf %97, %103 : vector<16x256xf32>
    %cst_36 = arith.constant dense<0.000000e+00> : vector<32x256xf32>
    %105 = tpu.matmul %2, %104, %cst_36 {dimension_numbers = #tpu.dot_dimension_numbers<[1], [0], [0], [1], [0, 0, 1, 1], [], []>} : vector<32x16xf32>, vector<16x256xf32>, vector<32x256xf32> -> vector<32x256xf32>
    %c0_37 = arith.constant 0 : index
    %c0_38 = arith.constant 0 : index
    %106 = vector.load %arg6[%c0_37, %c0_38] : memref<32x8xf32, #tpu.memory_space<vmem>>, vector<32x8xf32>
    %c0_39 = arith.constant 0 : index
    %c0_40 = arith.constant 0 : index
    %c0_41 = arith.constant 0 : index
    %107 = vector.load %arg5[%c0_39, %c0_40, %c0_41] : memref<1x8x256xf32, #tpu.memory_space<vmem>>, vector<1x8x256xf32>
    %108 = vector.shape_cast %107 : vector<1x8x256xf32> to vector<8x256xf32>
    %cst_42 = arith.constant dense<0.000000e+00> : vector<32x256xf32>
    %109 = tpu.matmul %106, %108, %cst_42 {dimension_numbers = #tpu.dot_dimension_numbers<[1], [0], [0], [1], [0, 0, 1, 1], [], []>} : vector<32x8xf32>, vector<8x256xf32>, vector<32x256xf32> -> vector<32x256xf32>
    %110 = arith.addf %105, %109 : vector<32x256xf32>
    %c0_43 = arith.constant 0 : index
    %c0_44 = arith.constant 0 : index
    %111 = vector.load %arg8[%c0_43, %c0_44] : memref<32x1xf32, #tpu.memory_space<vmem>>, vector<32x1xf32>
    %112 = vector.broadcast %111 : vector<32x1xf32> to vector<32x256xf32>
    %113 = arith.addf %110, %112 : vector<32x256xf32>
    %c0_45 = arith.constant 0 : index
    %c0_46 = arith.constant 0 : index
    %c0_47 = arith.constant 0 : index
    %114 = vector.load %arg9[%c0_45, %c0_46, %c0_47] : memref<1x32x256xf32, #tpu.memory_space<vmem>>, vector<1x32x256xf32>
    %115 = vector.shape_cast %114 : vector<1x32x256xf32> to vector<32x256xf32>
    %116 = vector.shape_cast %113 : vector<32x256xf32> to vector<1x32x256xf32>
    tpu.vector_store %arg9[%c0_45, %c0_46, %c0_47], %116 {strides = array<i32>} : memref<1x32x256xf32, #tpu.memory_space<vmem>>, vector<1x32x256xf32>,
    %cst_48 = arith.constant dense<0.000000e+00> : vector<32xf32>
    %117 = vector.multi_reduction <add>, %113, %cst_48 [1] : vector<32x256xf32> to vector<32xf32>
    %118 = vector.shape_cast %117 : vector<32xf32> to vector<32x1xf32>
    %c0_49 = arith.constant 0 : index
    %c0_50 = arith.constant 0 : index
    %c0_51 = arith.constant 0 : index
    %c0_52 = arith.constant 0 : index
    %119 = vector.load %arg10[%c0_49, %c0_50, %c0_51, %c0_52] : memref<1x1x32x1xf32, #tpu.memory_space<vmem>>, vector<1x1x32x1xf32>
    %120 = vector.shape_cast %119 : vector<1x1x32x1xf32> to vector<32x1xf32>
    %121 = vector.shape_cast %118 : vector<32x1xf32> to vector<1x1x32x1xf32>
    tpu.vector_store %arg10[%c0_49, %c0_50, %c0_51, %c0_52], %121 {strides = array<i32>} : memref<1x1x32x1xf32, #tpu.memory_space<vmem>>, vector<1x1x32x1xf32>,
    %122 = arith.mulf %113, %113 : vector<32x256xf32>
    %cst_53 = arith.constant dense<0.000000e+00> : vector<32xf32>
    %123 = vector.multi_reduction <add>, %122, %cst_53 [1] : vector<32x256xf32> to vector<32xf32>
    %124 = vector.shape_cast %123 : vector<32xf32> to vector<32x1xf32>
    %c0_54 = arith.constant 0 : index
    %c0_55 = arith.constant 0 : index
    %c0_56 = arith.constant 0 : index
    %c0_57 = arith.constant 0 : index
    %125 = vector.load %arg11[%c0_54, %c0_55, %c0_56, %c0_57] : memref<1x1x32x1xf32, #tpu.memory_space<vmem>>, vector<1x1x32x1xf32>
    %126 = vector.shape_cast %125 : vector<1x1x32x1xf32> to vector<32x1xf32>
    %127 = vector.shape_cast %124 : vector<32x1xf32> to vector<1x1x32x1xf32>
    tpu.vector_store %arg11[%c0_54, %c0_55, %c0_56, %c0_57], %127 {strides = array<i32>} : memref<1x1x32x1xf32, #tpu.memory_space<vmem>>, vector<1x1x32x1xf32>,
    return
  }
  func.func @transform_0(%arg0: i32, %arg1: i32) -> (i32, i32, i32) {
    %c0_i32 = arith.constant 0 : i32
    %c0_i32_0 = arith.constant 0 : i32
    return %arg0, %c0_i32, %arg1 : i32, i32, i32
  }
  func.func @transform_1(%arg0: i32, %arg1: i32) -> (i32, i32, i32) {
    %c0_i32 = arith.constant 0 : i32
    %c0_i32_0 = arith.constant 0 : i32
    %c0_i32_1 = arith.constant 0 : i32
    return %arg0, %c0_i32, %c0_i32_0 : i32, i32, i32
  }
  func.func @transform_2(%arg0: i32, %arg1: i32) -> (i32, i32, i32) {
    %c0_i32 = arith.constant 0 : i32
    %c0_i32_0 = arith.constant 0 : i32
    %c0_i32_1 = arith.constant 0 : i32
    return %arg0, %c0_i32, %c0_i32_0 : i32, i32, i32
  }
  func.func @transform_3(%arg0: i32, %arg1: i32) -> (i32, i32, i32) {
    %c0_i32 = arith.constant 0 : i32
    %c0_i32_0 = arith.constant 0 : i32
    return %arg0, %c0_i32, %arg1 : i32, i32, i32
  }
  func.func @transform_4(%arg0: i32, %arg1: i32) -> (i32, i32) {
    %c0_i32 = arith.constant 0 : i32
    %c0_i32_0 = arith.constant 0 : i32
    %c0_i32_1 = arith.constant 0 : i32
    return %c0_i32, %c0_i32_0 : i32, i32
  }
  func.func @transform_5(%arg0: i32, %arg1: i32) -> (i32, i32) {
    %c0_i32 = arith.constant 0 : i32
    %c0_i32_0 = arith.constant 0 : i32
    %c0_i32_1 = arith.constant 0 : i32
    return %c0_i32, %c0_i32_0 : i32, i32
  }
  func.func @transform_6(%arg0: i32, %arg1: i32) -> (i32, i32) {
    %c0_i32 = arith.constant 0 : i32
    %c0_i32_0 = arith.constant 0 : i32
    %c0_i32_1 = arith.constant 0 : i32
    return %c0_i32, %c0_i32_0 : i32, i32
  }
  func.func @transform_7(%arg0: i32, %arg1: i32) -> (i32, i32, i32) {
    %c0_i32 = arith.constant 0 : i32
    %c0_i32_0 = arith.constant 0 : i32
    return %arg0, %c0_i32, %arg1 : i32, i32, i32
  }
  func.func @transform_8(%arg0: i32, %arg1: i32) -> (i32, i32, i32, i32) {
    %c0_i32 = arith.constant 0 : i32
    %c0_i32_0 = arith.constant 0 : i32
    %c0_i32_1 = arith.constant 0 : i32
    return %arg0, %arg1, %c0_i32, %c0_i32_0 : i32, i32, i32, i32
  }
  func.func @transform_9(%arg0: i32, %arg1: i32) -> (i32, i32, i32, i32) {
    %c0_i32 = arith.constant 0 : i32
    %c0_i32_0 = arith.constant 0 : i32
    %c0_i32_1 = arith.constant 0 : i32
    return %arg0, %arg1, %c0_i32, %c0_i32_0 : i32, i32, i32, i32
  }
}

</mosaic_0001>

<bundles_post_ra>
// kernel: tpu_custom_call.1
= control target key start
LH: loop header
LB: loop body
LE: loop exit
PB: predicated region body
PF: predicated region fallthrough
CT: control target
= control target key end

     0   :  { %s2143_s0 = inlined_call_operand.vmem [shape: f32[2,3,256], index: 0, kind: input, shape index: {}]   ;;  %s2144_s1 = inlined_call_operand.vmem [shape: f32[2,16,3], index: 1, kind: input, shape index: {}]   ;;  %s2145_s2 = inlined_call_operand.vmem [shape: f32[2,16,16], index: 2, kind: input, shape index: {}]   ;;  %s2146_s3 = inlined_call_operand.vmem [shape: f32[2,8,256], index: 3, kind: input, shape index: {}]   ;;  %s2147_s4 = inlined_call_operand.vmem [shape: f32[32,8], index: 4, kind: input, shape index: {}]   ;;  %s2148_s5 = inlined_call_operand.vmem [shape: f32[32,16], index: 5, kind: input, shape index: {}]   ;;  %s2149_s6 = inlined_call_operand.vmem [shape: f32[32,1], index: 6, kind: input, shape index: {}]   ;;  %s2150_s7 = inlined_call_operand.hbm [shape: f32[2,32,256], index: 7, kind: output, shape index: {0}]   ;;  %s2151_s8 = inlined_call_operand.vmem [shape: f32[2,1,32,1], index: 8, kind: output, shape index: {1}]   ;;  %s2152_s9 = inlined_call_operand.vmem [shape: f32[2,1,32,1], index: 9, kind: output, shape index: {2}]  }
   0x1   :  { %2153 = sst [smem:[#allocation5_spill]] %s2143_s0 }
   0x2   :  { %2154 = sst [smem:[#allocation6_spill]] %s2144_s1 }
   0x3   :  { %2155 = sst [smem:[#allocation7_spill]] %s2145_s2 }
   0x4   :  { %15 = vsyncpa [#allocation3], 0 }
   0x5   :  { %17 = vsyncpa [#allocation3 + $0x1], 0  ;;  %s1682_s30 = smov 0   ;;  %s1684_s10 = smov 0  }
   0x6   :  { %s1686_s11 = smov 0   ;;  %s1688_s12 = smov 0  }
   0x7   :  { %s1690_s13 = smov 0   ;;  %s1692_s14 = smov 0  }
   0x8 LB: > { %s1416_s15 = sadd.s32 4294967295, %s1627_s14   ;;  %s1417_s16 = sadd.s32 4294967294, %s1627_s14   ;;  %s1627_s14 = sphi %s1692_s14, %s23_s14   ;;  %s1623_s13 = sphi %s1690_s13, %s2175_s13   ;;  %s1619_s12 = sphi %s1688_s12, %s2174_s12   ;;  %s1615_s11 = sphi %s1686_s11, %s2173_s11   ;;  %s1611_s10 = sphi %s1684_s10, %s2172_s10   ;;  %s1607_s30 = sphi %s1682_s30, %s2171_s30  }
   0x9   : > { %s35_s17 = sadd.s32 1, %s1623_s13  ;;  %s215_s18 = sadd.s32 1, %s1615_s11 }
   0xa   : > { %p37_p0 = scmp.ge.s32.totalorder %s35_s17, 2  ;;  %p225_p1 = scmp.ne.s32.totalorder %s1615_s11, %s1611_s10 }
   0xb   : > { %p226_p2 = scmp.eq.s32.totalorder %s1416_s15, 1  ;;  %p231_p3 = scmp.ne.s32.totalorder %s1611_s10, %s1607_s30 }
   0xc   : > { %s2177_s17 = smov (%p37_p0, %s35_s17), 0  ;;  %p232_p5 = scmp.eq.s32.totalorder %s1417_s16, 1 }
   0xd   : > { %p1722_p4 = por %p226_p2, %p225_p1  ;;  %s210_s20 = ssub.s32 %s1623_s13, %s2177_s17 }
   0xe   : > { %p1420_p6 = scmp.ge.s32.totalorder %s1627_s14, 1  ;;  %p213_p7 = scmp.eq.s32.totalorder %s210_s20, 0 }
   0xf   : > { %p1729_p8 = por %p232_p5, %p231_p3  ;;  %p357_p9 = scmp.lt.s32.totalorder %s1627_s14, 3 }
  0x10   : > { %s1735_s22 = scalar_select %p213_p7, %s1615_s11, %s215_s18  }
  0x11   : > { %p358_p10 = pnand %p1420_p6, %p357_p9 }
  0x12   : > { %p435_p11 = scmp.lt.s32.totalorder (!%p358_p10), %s1619_s12, 1  ;;  %s2158_s0 = sld [smem:[#allocation5_spill]] (!%p358_p10) }
  0x13   : > { %361 = sbr.rel (%p358_p10) target bundleno = 724 (0x2d4), region = 48  ;;  %s2159_s1 = sld [smem:[#allocation6_spill]] (!%p358_p10) }
  0x14   : > { %s2170_s2 = sld [smem:[#allocation7_spill]] (!%p358_p10)  ;;  %s1471_s26 = sshll.u32 (!%p358_p10), %s1619_s12, 6 }
  0x15   : > { %s1203_s29 = scalar_lea.hbm (!%p358_p10), %s2150_s7, %s1471_s26 }
  0x18   : > { %s1739_s23 = scalar_select %p435_p11, %s1619_s12, 1  ;;  %vm494_vm0 = vcmask 23552   ;;  %vm511_vm1 = vcmask 1042432   ;;  %v591_v35 = vlaneseq }
  0x1a   : > { %s1465_s24 = sshll.u32 %s1739_s23, 3  ;;  %s1743_s25 = sshll.u32 %s1739_s23, 4  ;;  %v1774_v42 = vshrl.u32 %v591_v35, 7 }
  0x1b   : > { %s442_s28 = scalar_lea.vmem %s2158_s0, %s1465_s24  ;;  %s448_s16 = scalar_lea.vmem %s2159_s1, %s1743_s25 }
  0x1c   : > { %v489_v0 = vld [vmem:[%s442_s28] sm:$0x77]  ;;  %v491_v4 = vld [vmem:[%s448_s16 + $0x8] sm:$0xff]  ;;  %v1777_v49 = vadd.s32 8, %v1774_v42  ;;  %s1997_s24 = scalar_lea.vmem %s2170_s2, %s1743_s25  ;;  %s462_s28 = scalar_lea.vmem %s2146_s3, %s1743_s25 }
  0x1d   : > { %v490_v1 = vld [vmem:[%s448_s16] sm:$0xff]  ;;  %502 = vst [vmem:[#allocation1] ss:$2 sm:$0xff] %v489_v0  ;;  %v570_v5 = vmul.f32 %v489_v0, %v489_v0  ;;  %v493_v6 = vmul.f32 %v491_v4, %v491_v4  ;;  %s409_s25 = sand.u32 1, %s1611_s10   ;;  %s1206_s16 = sshll.u32 %s1203_s29, 4  ;;  %s1207_s16 = int_to_ptr.hbm [resolvable:$true] %s1206_s16 }
  0x1e   : > { %v492_v2 = vmul.f32 %v490_v1, %v490_v1  ;;  %s1421_s20 = sshll.u32 %s409_s25, 6  ;;  %s1172_s18 = scalar_lea.sflag [#allocation3], %s409_s25 }
  0x1f   : > { %v498_v9 = vsel %vm494_vm0, %v493_v6, 0.0  ;;  %s1569_s2 = scalar_lea.hbm %s2150_s7, 128 }
  0x20   : > { %v495_v3 = vsel %vm494_vm0, %v492_v2, 0.0 }
  0x21   : > { %496 = vadd.xlane.f32.xlu0 %v495_v3 }
  0x24   : > { %v503_v7 = vld.sshfl [vmem:[#allocation1] sm:$0xff pattern:$0x75316420]  ;;  %v504_v8 = vld.sshfl [vmem:[#allocation1 + $0x8] sm:$0xff pattern:$0x75316420] }
  0x25   : > { %1434 = vmatpush.msk.msra.mxu0 %vm511_vm1, %v503_v7  ;;  %1437 = vmatpush.msk.msra.mxu1 %vm511_vm1, %v504_v8  ;;  %572 = vst [vmem:[#allocation1] ss:$2 sm:$0xff] %v570_v5 }
  0x26   : > { %1435 = vmatmul.msk.f32.vlgmr.msra.gmra.mxu0 %vm494_vm0, %v490_v1  ;;  %1438 = vmatmul.msk.f32.vlgmr.msra.gmra.mxu1 %vm494_vm0, %v490_v1 }
  0x29   : > { %499 = vadd.xlane.f32.xlu0 %v498_v9 }
  0x2c   : > { %v573_v13 = vld.sshfl [vmem:[#allocation1] sm:$0xff pattern:$0x75316420]  ;;  %v574_v17 = vld.sshfl [vmem:[#allocation1 + $0x8] sm:$0xff pattern:$0x75316420] }
  0x2d   : > { %v577_v18 = vsel %vm511_vm1, %v573_v13, 0.0  ;;  %v584_v24 = vsel %vm511_vm1, %v574_v17, 0.0 }
  0x2e   : > { %1436 = vmatmul.msk.f32.gmra.mxu0 %vm494_vm0, %v491_v4  ;;  %1439 = vmatmul.msk.f32.gmra.mxu1 %vm494_vm0, %v491_v4  ;;  %v578_v23 = vrot.slane %v577_v18, 4  ;;  %v585_v29 = vrot.slane %v584_v24, 4 }
  0x30   : > { %v579_v32 = vadd.f32 %v578_v23, %v577_v18  ;;  %v586_v36 = vadd.f32 %v585_v29, %v584_v24 }
  0x32   : > { %v580_v39 = vrot.slane %v579_v32, 2  ;;  %v587_v43 = vrot.slane %v586_v36, 2 }
  0x34   : > { %v581_v46 = vadd.f32 %v580_v39, %v579_v32  ;;  %v588_v50 = vadd.f32 %v587_v43, %v586_v36 }
  0x36   : > { %v582_v53 = vrot.slane %v581_v46, 1  ;;  %v589_v58 = vrot.slane %v588_v50, 1 }
  0x38   : > { %v1787_v61 = vadd.f32 %v582_v53, %v581_v46  ;;  %v1789_v0 = vadd.f32 %v589_v58, %v588_v50 }
  0x94   : > { %v497_v10 = vpop.xlane.xlu0 %496 }
  0x9c   : > { %v500_v16 = vpop.xlane.xlu0 %499 }
  0xa3   : > { %v533_v11 = vpop.f32.mrf.mxu0  ;;  %v556_v12 = vpop.f32.mrf.mxu1 }
  0xa4   : > { %v562_v14 = vmul.f32 2.0, %v533_v11  ;;  %v563_v15 = vmul.f32 2.0, %v556_v12 }
  0xa6   : > { %v1762_v25 = vsub.f32 %v497_v10, %v562_v14  ;;  %v1764_v26 = vsub.f32 %v497_v10, %v563_v15 }
  0xab   : > { %v536_v19 = vpop.f32.mrf.mxu0  ;;  %v559_v20 = vpop.f32.mrf.mxu1 }
  0xac   : > { %v564_v21 = vmul.f32 2.0, %v536_v19  ;;  %v565_v22 = vmul.f32 2.0, %v559_v20 }
  0xae   : > { %v1766_v27 = vsub.f32 %v500_v16, %v564_v21  ;;  %v1768_v28 = vsub.f32 %v500_v16, %v565_v22 }
  0xb0   : > { %v594_v30 = vmin.f32 %v1762_v25, %v1766_v27  ;;  %v601_v31 = vmin.f32 %v1764_v26, %v1768_v28 }
  0xb2   : > { %v595_v33 = vrot.slane %v594_v30, 4  ;;  %v602_v34 = vrot.slane %v601_v31, 4 }
  0xb4   : > { %v596_v37 = vmin.f32 %v594_v30, %v595_v33  ;;  %v603_v38 = vmin.f32 %v601_v31, %v602_v34 }
  0xb6   : > { %v597_v40 = vrot.slane %v596_v37, 2  ;;  %v604_v41 = vrot.slane %v603_v38, 2 }
  0xb8   : > { %v598_v44 = vmin.f32 %v596_v37, %v597_v40  ;;  %v605_v45 = vmin.f32 %v603_v38, %v604_v41 }
  0xba   : > { %v599_v47 = vrot.slane %v598_v44, 1  ;;  %v606_v48 = vrot.slane %v605_v45, 1 }
  0xbc   : > { %v600_v51 = vmin.f32 %v598_v44, %v599_v47  ;;  %v607_v52 = vmin.f32 %v605_v45, %v606_v48 }
  0xbe   : > { %vm608_vm2 = vcmp.eq.f32.partialorder %v1762_v25, %v600_v51  ;;  %vm609_vm3 = vcmp.eq.f32.partialorder %v1764_v26, %v607_v52  ;;  %vm610_vm4 = vcmp.eq.f32.partialorder %v1766_v27, %v600_v51  ;;  %vm611_vm5 = vcmp.eq.f32.partialorder %v1768_v28, %v607_v52 }
  0xbf   : > { %v612_v54 = vsel %vm608_vm2, %v1774_v42, 16  ;;  %v613_v55 = vsel %vm609_vm3, %v1774_v42, 16  ;;  %v614_v56 = vsel %vm610_vm4, %v1777_v49, 16  ;;  %v615_v57 = vsel %vm611_vm5, %v1777_v49, 16 }
  0xc0   : > { %vm616_vm6 = vcmp.lt.s32.totalorder %v612_v54, %v614_v56  ;;  %vm627_vm7 = vcmp.lt.s32.totalorder %v613_v55, %v615_v57  ;;  %v642_v2 = vadd.f32 %v600_v51, %v1787_v61  ;;  %v643_v6 = vadd.f32 %v607_v52, %v1789_v0 }
  0xc1   : > { %v617_v59 = vsel %vm616_vm6, %v612_v54, %v614_v56  ;;  %v628_v60 = vsel %vm627_vm7, %v613_v55, %v615_v57 }
  0xc2   : > { %v618_v62 = vrot.slane %v617_v59, 4  ;;  %v629_v63 = vrot.slane %v628_v60, 4  ;;  %v1793_v8 = vmax.f32 %v642_v2, 1e-10  ;;  %v1795_v12 = vmax.f32 %v643_v6, 1e-10 }
  0xc4   : > { %vm619_vm8 = vcmp.lt.s32.totalorder %v617_v59, %v618_v62  ;;  %vm630_vm9 = vcmp.lt.s32.totalorder %v628_v60, %v629_v63  ;;  %1533 = vrcp.f32 %v1793_v8  ;;  %v655_v41 = vand.u32 2147483647, %v1793_v8 }
  0xc5   : > { %v620_v1 = vsel %vm619_vm8, %v617_v59, %v618_v62  ;;  %v631_v4 = vsel %vm630_vm9, %v628_v60, %v629_v63  ;;  %1535 = vrcp.f32 %v1795_v12  ;;  %vm651_vm9 = vweird.f32 %v1793_v8 }
  0xc6   : > { %v621_v3 = vrot.slane %v620_v1, 2  ;;  %v632_v5 = vrot.slane %v631_v4, 2  ;;  %v657_v55 = vand.u32 2147483648, %v1793_v8  ;;  %v670_v6 = vand.u32 2147483647, %v1795_v12 }
  0xc8   : > { %vm622_vm10 = vcmp.lt.s32.totalorder %v620_v1, %v621_v3  ;;  %vm633_vm11 = vcmp.lt.s32.totalorder %v631_v4, %v632_v5 }
  0xc9   : > { %v623_v7 = vsel %vm622_vm10, %v620_v1, %v621_v3  ;;  %v634_v10 = vsel %vm633_vm11, %v631_v4, %v632_v5  ;;  %vm1869_vm11 = vcmp.eq.f32.partialorder %v655_v41, 8.507059e+37  ;;  %v658_v5 = vor.u32 1.1754944e-38, %v657_v55 }
  0xca   : > { %v624_v9 = vrot.slane %v623_v7, 1  ;;  %v635_v11 = vrot.slane %v634_v10, 1  ;;  %v1839_v22 = vpop.eup %1533 }
  0xcb   : > { %vm652_vm7 = vweird.f32 %v1839_v22 }
  0xcc   : > { %vm625_vm12 = vcmp.lt.s32.totalorder %v623_v7, %v624_v9  ;;  %vm636_vm13 = vcmp.lt.s32.totalorder %v634_v10, %v635_v11 }
  0xcd   : > { %v1797_v13 = vsel %vm625_vm12, %v623_v7, %v624_v9  ;;  %v1804_v14 = vsel %vm636_vm13, %v634_v10, %v635_v11  ;;  %vm1874_vm12 = vmor %vm651_vm9, %vm652_vm7  ;;  %vm666_vm13 = vweird.f32 %v1795_v12  ;;  %v672_v11 = vand.u32 2147483648, %v1795_v12 }
  0xce   : > { %vm638_vm14 = vcmp.eq.s32.totalorder %v1774_v42, %v1797_v13  ;;  %vm640_vm15 = vcmp.eq.s32.totalorder %v1777_v49, %v1797_v13  ;;  %vm639_vm0 = vcmp.eq.s32.totalorder %v1774_v42, %v1804_v14  ;;  %vm641_vm1 = vcmp.eq.s32.totalorder %v1777_v49, %v1804_v14  ;;  %v948_v14 = vld [vmem:[%s462_s28 + $0x8] sm:$0xff] }
  0xcf   : > { %v1810_v15 = vsel %vm638_vm14, inf, %v1762_v25  ;;  %v1816_v16 = vsel %vm640_vm15, inf, %v1766_v27  ;;  %v1829_v18 = vsel %vm639_vm0, inf, %v1764_v26  ;;  %v1835_v19 = vsel %vm641_vm1, inf, %v1768_v28  ;;  %v1841_v25 = vpop.eup %1535  ;;  %1006 = vmatpush.msrb.mxu1 %v948_v14 }
  0xd0   : > { %v690_v17 = vmin.f32 %v1810_v15, %v1816_v16  ;;  %v697_v21 = vmin.f32 %v1829_v18, %v1835_v19  ;;  %v647_v26 = vmul.f32 %v1839_v22, %v1793_v8  ;;  %v662_v28 = vmul.f32 %v1841_v25, %v1795_v12 }
  0xd2   : > { %v691_v20 = vrot.slane %v690_v17, 4  ;;  %v698_v24 = vrot.slane %v697_v21, 4  ;;  %v648_v34 = vsub.f32 1.0, %v647_v26  ;;  %v663_v37 = vsub.f32 1.0, %v662_v28 }
  0xd4   : > { %v692_v23 = vmin.f32 %v690_v17, %v691_v20  ;;  %v699_v29 = vmin.f32 %v697_v21, %v698_v24  ;;  %v649_v40 = vmul.f32 %v1839_v22, %v648_v34  ;;  %v664_v52 = vmul.f32 %v1841_v25, %v663_v37 }
  0xd6   : > { %v693_v27 = vrot.slane %v692_v23, 2  ;;  %v700_v31 = vrot.slane %v699_v29, 2  ;;  %v650_v53 = vadd.f32 %v1839_v22, %v649_v40  ;;  %v1879_v63 = vadd.f32 %v1841_v25, %v664_v52 }
  0xd8   : > { %v694_v30 = vmin.f32 %v692_v23, %v693_v27  ;;  %v701_v33 = vmin.f32 %v699_v29, %v700_v31  ;;  %v654_v1 = vsel %vm1874_vm12, %v1839_v22, %v650_v53 }
  0xd9   : > { %v1897_v20 = vsel %vm1869_vm11, %v658_v5, %v654_v1 }
  0xda   : > { %v695_v32 = vrot.slane %v694_v30, 1  ;;  %v702_v36 = vrot.slane %v701_v33, 1 }
  0xdc   : > { %v696_v35 = vmin.f32 %v694_v30, %v695_v32  ;;  %v703_v39 = vmin.f32 %v701_v33, %v702_v36 }
  0xde   : > { %vm704_vm2 = vcmp.eq.f32.partialorder %v1810_v15, %v696_v35  ;;  %vm706_vm3 = vcmp.eq.f32.partialorder %v1816_v16, %v696_v35  ;;  %v738_v38 = vadd.f32 %v696_v35, %v1787_v61  ;;  %vm705_vm5 = vcmp.eq.f32.partialorder %v1829_v18, %v703_v39 }
  0xdf   : > { %v708_v43 = vsel %vm704_vm2, %v1774_v42, 16  ;;  %v710_v44 = vsel %vm706_vm3, %v1777_v49, 16  ;;  %vm707_vm6 = vcmp.eq.f32.partialorder %v1835_v19, %v703_v39  ;;  %v709_v47 = vsel %vm705_vm5, %v1774_v42, 16 }
  0xe0   : > { %vm712_vm4 = vcmp.lt.s32.totalorder %v708_v43, %v710_v44  ;;  %v1854_v45 = vmax.f32 %v738_v38, 1e-10  ;;  %v711_v48 = vsel %vm707_vm6, %v1777_v49, 16  ;;  %v739_v50 = vadd.f32 %v703_v39, %v1789_v0 }
  0xe1   : > { %v713_v46 = vsel %vm712_vm4, %v708_v43, %v710_v44  ;;  %vm723_vm8 = vcmp.lt.s32.totalorder %v709_v47, %v711_v48  ;;  %vm667_vm2 = vweird.f32 %v1841_v25 }
  0xe2   : > { %v714_v51 = vrot.slane %v713_v46, 4  ;;  %1537 = vrcp.f32 %v1854_v45  ;;  %v1865_v54 = vmax.f32 %v739_v50, 1e-10  ;;  %v724_v56 = vsel %vm723_vm8, %v709_v47, %v711_v48  ;;  %vm1890_vm5 = vmor %vm666_vm13, %vm667_vm2 }
  0xe3   : > { %v725_v59 = vrot.slane %v724_v56, 4  ;;  %v751_v2 = vand.u32 2147483647, %v1854_v45  ;;  %v753_v3 = vand.u32 2147483648, %v1854_v45  ;;  %vm747_vm6 = vweird.f32 %v1854_v45 }
  0xe4   : > { %vm715_vm10 = vcmp.lt.s32.totalorder %v713_v46, %v714_v51  ;;  %1539 = vrcp.f32 %v1865_v54  ;;  %v669_v22 = vsel %vm1890_vm5, %v1841_v25, %v1879_v63  ;;  %v766_v31 = vand.u32 2147483647, %v1865_v54 }
  0xe5   : > { %v716_v58 = vsel %vm715_vm10, %v713_v46, %v714_v51  ;;  %vm726_vm3 = vcmp.lt.s32.totalorder %v724_v56, %v725_v59  ;;  %vm1904_vm7 = vcmp.eq.f32.partialorder %v751_v2, 8.507059e+37  ;;  %v754_v12 = vor.u32 1.1754944e-38, %v753_v3 }
  0xe6   : > { %v717_v62 = vrot.slane %v716_v58, 2  ;;  %v727_v7 = vsel %vm726_vm3, %v724_v56, %v725_v59  ;;  %vm1908_vm10 = vcmp.eq.f32.partialorder %v670_v6, 8.507059e+37  ;;  %v768_v34 = vand.u32 2147483648, %v1865_v54 }
  0xe7   : > { %v728_v17 = vrot.slane %v727_v7, 2  ;;  %v673_v46 = vor.u32 1.1754944e-38, %v672_v11 }
  0xe8   : > { %v1538_v4 = vpop.eup %1537  ;;  %vm718_vm4 = vcmp.lt.s32.totalorder %v716_v58, %v717_v62  ;;  %v769_v47 = vor.u32 1.1754944e-38, %v768_v34 }
  0xe9   : > { %v719_v8 = vsel %vm718_vm4, %v716_v58, %v717_v62  ;;  %v743_v9 = vmul.f32 %v1538_v4, %v1854_v45  ;;  %vm729_vm8 = vcmp.lt.s32.totalorder %v727_v7, %v728_v17  ;;  %vm748_vm11 = vweird.f32 %v1538_v4 }
  0xea   : > { %v720_v21 = vrot.slane %v719_v8, 1  ;;  %v1540_v23 = vpop.eup %1539  ;;  %v730_v26 = vsel %vm729_vm8, %v727_v7, %v728_v17  ;;  %vm749_vm3 = vmor %vm747_vm6, %vm748_vm11  ;;  %v1956_v53 = vsel %vm1908_vm10, %v673_v46, %v669_v22 }
  0xeb   : > { %v744_v24 = vsub.f32 1.0, %v743_v9  ;;  %v758_v30 = vmul.f32 %v1540_v23, %v1865_v54  ;;  %v731_v32 = vrot.slane %v730_v26, 1  ;;  %vm763_vm4 = vweird.f32 %v1540_v23 }
  0xec   : > { %vm721_vm9 = vcmp.lt.s32.totalorder %v719_v8, %v720_v21 }
  0xed   : > { %v1914_v28 = vsel %vm721_vm9, %v719_v8, %v720_v21  ;;  %v745_v25 = vmul.f32 %v1538_v4, %v744_v24  ;;  %v759_v33 = vsub.f32 1.0, %v758_v30  ;;  %vm732_vm2 = vcmp.lt.s32.totalorder %v730_v26, %v731_v32 }
  0xee   : > { %vm734_vm12 = vcmp.eq.s32.totalorder %v1774_v42, %v1914_v28  ;;  %vm736_vm13 = vcmp.eq.s32.totalorder %v1777_v49, %v1914_v28  ;;  %v1931_v39 = vsel %vm732_vm2, %v730_v26, %v731_v32  ;;  %vm762_vm9 = vweird.f32 %v1865_v54 }
  0xef   : > { %v746_v35 = vadd.f32 %v1538_v4, %v745_v25  ;;  %v782_v36 = vsel %vm734_vm12, inf, %v1810_v15  ;;  %v784_v37 = vsel %vm736_vm13, inf, %v1816_v16  ;;  %v760_v40 = vmul.f32 %v1540_v23, %v759_v33  ;;  %vm764_vm6 = vmor %vm762_vm9, %vm763_vm4 }
  0xf0   : > { %v786_v38 = vmin.f32 %v782_v36, %v784_v37  ;;  %vm735_vm5 = vcmp.eq.s32.totalorder %v1774_v42, %v1931_v39  ;;  %vm737_vm8 = vcmp.eq.s32.totalorder %v1777_v49, %v1931_v39  ;;  %v677_v39 = vsel %vm639_vm0, %v1956_v53, 0.0 }
  0xf1   : > { %v750_v41 = vsel %vm749_vm3, %v1538_v4, %v746_v35  ;;  %v761_v43 = vadd.f32 %v1540_v23, %v760_v40  ;;  %v783_v44 = vsel %vm735_vm5, inf, %v1829_v18  ;;  %v785_v48 = vsel %vm737_vm8, inf, %v1835_v19 }
  0xf2   : > { %v1940_v15 = vsel %vm1904_vm7, %v754_v12, %v750_v41  ;;  %v787_v16 = vrot.slane %v786_v38, 4  ;;  %vm767_vm7 = vcmp.eq.f32.partialorder %v766_v31, 8.507059e+37  ;;  %v793_v52 = vmin.f32 %v783_v44, %v785_v48 }
  0xf3   : > { %v1948_v45 = vadd.f32 %v1940_v15, %v1897_v20  ;;  %v765_v51 = vsel %vm764_vm6, %v1540_v23, %v761_v43  ;;  %v774_v26 = vsel %vm736_vm13, %v1940_v15, 0.0  ;;  %v772_v33 = vsel %vm734_vm12, %v1940_v15, 0.0 }
  0xf4   : > { %v788_v50 = vmin.f32 %v786_v38, %v787_v16  ;;  %v1958_v18 = vsel %vm767_vm7, %v769_v47, %v765_v51  ;;  %v794_v56 = vrot.slane %v793_v52, 4  ;;  %vm949_vm0 = vcmask 64512  }
  0xf5   : > { %v1962_v55 = vadd.f32 %v1958_v18, %v1956_v53 }
  0xf6   : > { %v789_v54 = vrot.slane %v788_v50, 2  ;;  %v795_v58 = vmin.f32 %v793_v52, %v794_v56  ;;  %v775_v52 = vsel %vm737_vm8, %v1958_v18, 0.0 }
  0xf8   : > { %v790_v57 = vmin.f32 %v788_v50, %v789_v54  ;;  %v796_v19 = vrot.slane %v795_v58, 2 }
  0xfa   : > { %v791_v59 = vrot.slane %v790_v57, 1  ;;  %v797_v62 = vmin.f32 %v795_v58, %v796_v19  ;;  %v773_v19 = vsel %vm735_vm5, %v1958_v18, 0.0 }
  0xfc   : > { %v792_v60 = vmin.f32 %v790_v57, %v791_v59  ;;  %v798_v1 = vrot.slane %v797_v62, 1 }
  0xfe   : > { %vm800_vm11 = vcmp.eq.f32.partialorder %v782_v36, %v792_v60  ;;  %vm802_vm2 = vcmp.eq.f32.partialorder %v784_v37, %v792_v60  ;;  %v834_v63 = vadd.f32 %v792_v60, %v1787_v61  ;;  %v799_v5 = vmin.f32 %v797_v62, %v798_v1 }
  0xff   : > { %v804_v2 = vsel %vm800_vm11, %v1774_v42, 16  ;;  %v806_v3 = vsel %vm802_vm2, %v1777_v49, 16  ;;  %v676_v36 = vsel %vm638_vm14, %v1897_v20, 0.0 }
 0x100   : > { %vm808_vm10 = vcmp.lt.s32.totalorder %v804_v2, %v806_v3  ;;  %v836_v4 = vmax.f32 %v834_v63, 1e-10  ;;  %vm801_vm3 = vcmp.eq.f32.partialorder %v783_v44, %v799_v5  ;;  %vm803_vm4 = vcmp.eq.f32.partialorder %v785_v48, %v799_v5  ;;  %v483_v63 = vld [vmem:[%s1997_s24] sm:$0xff] }
 0x101   : > { %v809_v6 = vsel %vm808_vm10, %v804_v2, %v806_v3  ;;  %v835_v8 = vadd.f32 %v799_v5, %v1789_v0  ;;  %v805_v9 = vsel %vm801_vm3, %v1774_v42, 16  ;;  %v807_v61 = vsel %vm803_vm4, %v1777_v49, 16 }
 0x102   : > { %v810_v7 = vrot.slane %v809_v6, 4  ;;  %1541 = vrcp.f32 %v836_v4  ;;  %vm819_vm6 = vcmp.lt.s32.totalorder %v805_v9, %v807_v61  ;;  %v678_v0 = vsel %vm640_vm15, %v1897_v20, 0.0 }
 0x103   : > { %v837_v11 = vmax.f32 %v835_v8, 1e-10  ;;  %v820_v21 = vsel %vm819_vm6, %v805_v9, %v807_v61  ;;  %v847_v25 = vand.u32 2147483647, %v836_v4  ;;  %v849_v32 = vand.u32 2147483648, %v836_v4  ;;  %v944_v8 = vld [vmem:[%s2147_s4 + $0x8] sm:$0xff] }
 0x104   : > { %vm811_vm9 = vcmp.lt.s32.totalorder %v809_v6, %v810_v7  ;;  %v821_v22 = vrot.slane %v820_v21, 4  ;;  %v778_v37 = vadd.f32 %v774_v26, %v678_v0  ;;  %vm843_vm15 = vweird.f32 %v836_v4 }
 0x105   : > { %v812_v10 = vsel %vm811_vm9, %v809_v6, %v810_v7  ;;  %1543 = vrcp.f32 %v837_v11  ;;  %v776_v44 = vadd.f32 %v772_v33, %v676_v36  ;;  %vm848_vm4 = vcmp.eq.f32.partialorder %v847_v25, 8.507059e+37  ;;  %v484_v7 = vld [vmem:[%s1997_s24 + $0x8] sm:$0xff]  ;;  %v946_v25 = vld [vmem:[%s2147_s4 + $0x18] sm:$0xff]  ;;  %s2079_s24 = scalar_lea.vmem [#allocation2], %s1421_s20  ;;  %s1563_s20 = sshra.s32 %s1207_s16, 4  ;;  %s1564_s20 = int_to_ptr.hbm [resolvable:$true] %s1563_s20 }
 0x106   : > { %v813_v17 = vrot.slane %v812_v10, 2  ;;  %vm822_vm11 = vcmp.lt.s32.totalorder %v820_v21, %v821_v22  ;;  %v850_v28 = vor.u32 1.1754944e-38, %v849_v32  ;;  %v862_v46 = vand.u32 2147483647, %v837_v11  ;;  %v1092_v32 = vld [vmem:[%s2149_s6 + $0x10] sm:$0xff]  ;;  %s1204_s15 = sshll.u32 %s2079_s24, 4  ;;  %p1570_p1 = scmp.lt.s32.totalorder %s1564_s20, %s2150_s7  ;;  %s1205_s15 = int_to_ptr.vmem [resolvable:$true] %s1204_s15 }
 0x107   : > { %v823_v29 = vsel %vm822_vm11, %v820_v21, %v821_v22  ;;  %v864_v13 = vand.u32 2147483648, %v837_v11  ;;  %v777_v6 = vadd.f32 %v773_v19, %v677_v39  ;;  %v1629_v61 = vmov 0   ;;  %v945_v22 = vld [vmem:[%s2147_s4 + $0x10] sm:$0xff]  ;;  %s1565_s0 = scalar_lea.hbm %s1564_s20, 64 }
 0x108   : > { %v1542_v23 = vpop.eup %1541  ;;  %vm814_vm7 = vcmp.lt.s32.totalorder %v812_v10, %v813_v17  ;;  %v824_v31 = vrot.slane %v823_v29, 2  ;;  %vm863_vm8 = vcmp.eq.f32.partialorder %v862_v46, 8.507059e+37  ;;  %1530 = vset.pattern.permute.xlu1 %v1629_v61  ;;  %1531 = vset.pattern.permute.xlu2 %v1629_v61  ;;  %p1566_p12 = scmp.ne.s32.totalorder %s1564_s20, %s1565_s0  ;;  %p1571_p2 = scmp.lt.s32.totalorder %s1569_s2, %s1565_s0 }
 0x109   : > { %v815_v24 = vsel %vm814_vm7, %v812_v10, %v813_v17  ;;  %v839_v27 = vmul.f32 %v1542_v23, %v836_v4  ;;  %vm844_vm10 = vweird.f32 %v1542_v23  ;;  %vm858_vm7 = vweird.f32 %v837_v11  ;;  %1532 = vset.pattern.permute.xlu0 %v1629_v61  ;;  %1106 = vperm.xlu2 %1531, %v1092_v32  }
 0x10a   : > { %v816_v12 = vrot.slane %v815_v24, 1  ;;  %vm825_vm3 = vcmp.lt.s32.totalorder %v823_v29, %v824_v31  ;;  %vm845_vm13 = vmor %vm843_vm15, %vm844_vm10  ;;  %v865_v59 = vor.u32 1.1754944e-38, %v864_v13  ;;  %p1567_p13 = pnand %p1566_p12, %p1722_p4  ;;  %p1572_p3 = por %p1571_p2, %p1570_p1 }
 0x10b   : > { %v840_v30 = vsub.f32 1.0, %v839_v27  ;;  %v1544_v34 = vpop.eup %1543  ;;  %v826_v40 = vsel %vm825_vm3, %v823_v29, %v824_v31  ;;  %v485_v31 = vld [vmem:[%s2148_s5] sm:$0xff] }
 0x10c   : > { %vm817_vm2 = vcmp.lt.s32.totalorder %v815_v24, %v816_v12  ;;  %v854_v41 = vmul.f32 %v1544_v34, %v837_v11  ;;  %v827_v43 = vrot.slane %v826_v40, 1  ;;  %vm859_vm14 = vweird.f32 %v1544_v34  ;;  %p1568_p0 = pneg %p1567_p13 }
 0x10d   : > { %v841_v35 = vmul.f32 %v1542_v23, %v840_v30  ;;  %v818_v38 = vsel %vm817_vm2, %v815_v24, %v816_v12  ;;  %vm860_vm11 = vmor %vm858_vm7, %vm859_vm14  ;;  %vm878_vm2 = vcmask 130048  }
 0x10e   : > { %v855_v15 = vsub.f32 1.0, %v854_v41  ;;  %vm832_vm12 = vcmp.eq.s32.totalorder %v1777_v49, %v818_v38  ;;  %vm828_vm9 = vcmp.lt.s32.totalorder %v826_v40, %v827_v43  ;;  %vm830_vm6 = vcmp.eq.s32.totalorder %v1774_v42, %v818_v38  ;;  %v486_v38 = vld [vmem:[%s2148_s5 + $0x8] sm:$0xff]  ;;  %v488_v41 = vld [vmem:[%s2148_s5 + $0x18] sm:$0xff]  ;;  %p1573_p5 = pnand %p1572_p3, %p1568_p0 }
 0x10f   : > { %v842_v16 = vadd.f32 %v1542_v23, %v841_v35  ;;  %v829_v57 = vsel %vm828_vm9, %v826_v40, %v827_v43  ;;  %v487_v40 = vld [vmem:[%s2148_s5 + $0x10] sm:$0xff] }
 0x110   : > { %v856_v48 = vmul.f32 %v1544_v34, %v855_v15  ;;  %vm833_vm10 = vcmp.eq.s32.totalorder %v1777_v49, %v829_v57 }
 0x111   : > { %v846_v47 = vsel %vm845_vm13, %v1542_v23, %v842_v16  ;;  %v1091_v23 = vld [vmem:[%s2149_s6 + $0x8] sm:$0xff] }
 0x112   : > { %v851_v20 = vsel %vm848_vm4, %v850_v28, %v846_v47  ;;  %v857_v58 = vadd.f32 %v1544_v34, %v856_v48 }
 0x113   : > { %v870_v50 = vsel %vm832_vm12, %v851_v20, 0.0  ;;  %v876_v51 = vadd.f32 %v851_v20, %v1948_v45  ;;  %v868_v54 = vsel %vm830_vm6, %v851_v20, 0.0  ;;  %v679_v45 = vsel %vm641_vm1, %v1956_v53, 0.0  ;;  %v943_v53 = vld [vmem:[%s2147_s4] sm:$0xff] }
 0x114   : > { %v874_v56 = vadd.f32 %v870_v50, %v778_v37  ;;  %v861_v60 = vsel %vm860_vm11, %v1544_v34, %v857_v58  ;;  %v872_v62 = vadd.f32 %v868_v54, %v776_v44  ;;  %v779_v1 = vadd.f32 %v775_v52, %v679_v45  ;;  %1448 = vmatmul.msk.f32.vlgmr.msrb.gmra.mxu1 %vm949_vm0, %v943_v53  ;;  %v1093_v37 = vld [vmem:[%s2149_s6 + $0x18] sm:$0xff] }
 0x115   : > { %v866_v2 = vsel %vm863_vm8, %v865_v59, %v861_v60  ;;  %vm831_vm1 = vcmp.eq.s32.totalorder %v1774_v42, %v829_v57  ;;  %v947_v42 = vld [vmem:[%s462_s28] sm:$0xff]  ;;  %1545 = vrcp.f32 %v876_v51  ;;  %1111 = vperm.xlu2 %1531, %v1093_v37  }
 0x116   : > { %899 = vmatpush.msra.mxu2 %v874_v56  ;;  %v871_v3 = vsel %vm833_vm10, %v866_v2, 0.0  ;;  %v877_v4 = vadd.f32 %v866_v2, %v1962_v55  ;;  %v869_v18 = vsel %vm831_vm1, %v866_v2, 0.0  ;;  %977 = vmatpush.msrb.mxu0 %v947_v42  ;;  %v1090_v55 = vld [vmem:[%s2149_s6] sm:$0xff] }
 0x117   : > { %v875_v5 = vadd.f32 %v871_v3, %v779_v1  ;;  %v873_v49 = vadd.f32 %v869_v18, %v777_v6  ;;  %1444 = vmatmul.msk.f32.vlgmr.msrb.gmra.mxu0 %vm949_vm0, %v943_v53  ;;  %1096 = vperm.xlu1 %1530, %v1090_v55  }
 0x118   : > { %900 = vmatpush.msra.mxu2 %v872_v62  ;;  %1547 = vrcp.f32 %v877_v4 }
 0x119   : > { %1440 = vmatmul.msk.f32.vlgmr.msra.gmra.mxu2 %vm878_vm2, %v483_v63  ;;  %922 = vmatpush.msra.mxu3 %v875_v5 }
 0x11b   : > { %923 = vmatpush.msra.mxu3 %v873_v49  ;;  %v1546_v9 = vpop.eup %1545 }
 0x11c   : > { %1442 = vmatmul.msk.f32.vlgmr.msra.gmra.mxu3 %vm878_vm2, %v483_v63  ;;  %1449 = vmatmul.msk.f32.gmra.mxu1 %vm949_vm0, %v944_v8  ;;  %v933_v10 = vmul.f32 %v1546_v9, %v876_v51 }
 0x11e   : > { %v1548_v17 = vpop.eup %1547  ;;  %v935_v21 = vsub.f32 2.0, %v933_v10 }
 0x11f   : > { %1445 = vmatmul.msk.f32.gmra.mxu0 %vm949_vm0, %v944_v8  ;;  %v934_v24 = vmul.f32 %v1548_v17, %v877_v4  ;;  %1101 = vperm.xlu1 %1530, %v1091_v23  }
 0x120   : > { %v937_v12 = vmul.f32 %v1546_v9, %v935_v21 }
 0x121   : > { %1441 = vmatmul.msk.f32.gmra.mxu2 %vm878_vm2, %v484_v7  ;;  %v936_v29 = vsub.f32 2.0, %v934_v24 }
 0x123   : > { %v938_v33 = vmul.f32 %v1548_v17, %v936_v29 }
 0x124   : > { %1443 = vmatmul.msk.f32.gmra.mxu3 %vm878_vm2, %v484_v7  ;;  %1450 = vmatmul.msk.f32.gmra.mxu1 %vm949_vm0, %v945_v22 }
 0x127   : > { %1446 = vmatmul.msk.f32.gmra.mxu0 %vm949_vm0, %v945_v22 }
 0x12c   : > { %1451 = vmatmul.msk.f32.gmra.mxu1 %vm949_vm0, %v946_v25 }
 0x12f   : > { %1447 = vmatmul.msk.f32.gmra.mxu0 %vm949_vm0, %v946_v25 }
 0x163   : > { %v1107_v1 = vpop.permute.xlu2 %1106 }
 0x16f   : > { %v1112_v9 = vpop.permute.xlu2 %1111 }
 0x189   : > { %v1097_v28 = vpop.permute.xlu1 %1096 }
 0x191   : > { %v1008_v43 = vpop.f32.mrf.mxu1  ;;  %v1102_v56 = vpop.permute.xlu1 %1101 }
 0x194   : > { %v979_v16 = vpop.f32.mrf.mxu0 }
 0x199   : > { %v1011_v48 = vpop.f32.mrf.mxu1 }
 0x19c   : > { %v902_v11 = vpop.f32.mrf.mxu2  ;;  %v982_v46 = vpop.f32.mrf.mxu0 }
 0x19d   : > { %v939_v30 = vmul.f32 %v937_v12, %v902_v11 }
 0x19f   : > { %v925_v27 = vpop.f32.mrf.mxu3 }
 0x1a0   : > { %v940_v36 = vmul.f32 %v938_v33, %v925_v27 }
 0x1a1   : > { %v1014_v2 = vpop.f32.mrf.mxu1 }
 0x1a4   : > { %v905_v0 = vpop.f32.mrf.mxu2  ;;  %v985_v58 = vpop.f32.mrf.mxu0 }
 0x1a5   : > { %v941_v26 = vmul.f32 %v937_v12, %v905_v0 }
 0x1a7   : > { %1046 = vmatpush.msrb.mxu2 %v941_v26  ;;  %v928_v34 = vpop.f32.mrf.mxu3 }
 0x1a8   : > { %v942_v35 = vmul.f32 %v938_v33, %v928_v34 }
 0x1a9   : > { %1047 = vmatpush.msrb.mxu2 %v939_v30  ;;  %v1017_v10 = vpop.f32.mrf.mxu1 }
 0x1aa   : > { %1452 = vmatmul.msk.f32.vlgmr.msrb.gmra.mxu2 %vm878_vm2, %v485_v31  ;;  %1075 = vmatpush.msrb.mxu3 %v942_v35 }
 0x1ac   : > { %1076 = vmatpush.msrb.mxu3 %v940_v36  ;;  %v988_v42 = vpop.f32.mrf.mxu0 }
 0x1ad   : > { %1456 = vmatmul.msk.f32.vlgmr.msrb.gmra.mxu3 %vm878_vm2, %v485_v31 }
 0x1b2   : > { %1453 = vmatmul.msk.f32.gmra.mxu2 %vm878_vm2, %v486_v38 }
 0x1b5   : > { %1457 = vmatmul.msk.f32.gmra.mxu3 %vm878_vm2, %v486_v38 }
 0x1ba   : > { %1454 = vmatmul.msk.f32.gmra.mxu2 %vm878_vm2, %v487_v40 }
 0x1bd   : > { %1458 = vmatmul.msk.f32.gmra.mxu3 %vm878_vm2, %v487_v40 }
 0x1c2   : > { %1455 = vmatmul.msk.f32.gmra.mxu2 %vm878_vm2, %v488_v41 }
 0x1c5   : > { %1459 = vmatmul.msk.f32.gmra.mxu3 %vm878_vm2, %v488_v41 }
 0x22d   : > { %v1049_v44 = vpop.f32.mrf.mxu2 }
 0x22e   : > { %v1050_v15 = vadd.f32 %v1049_v44, %v979_v16 }
 0x230   : > { %v1114_v47 = vadd.f32 %v1097_v28, %v1050_v15  ;;  %v1078_v13 = vpop.f32.mrf.mxu3 }
 0x231   : > { %v1079_v20 = vadd.f32 %v1078_v13, %v1008_v43 }
 0x232   : > { %1122 = vst [vmem:[%s2079_s24] sm:$0xff] %v1114_v47  ;;  %v1147_v19 = vmul.f32 %v1114_v47, %v1114_v47 }
 0x233   : > { %v1115_v50 = vadd.f32 %v1097_v28, %v1079_v20 }
 0x235   : > { %v1052_v51 = vpop.f32.mrf.mxu2  ;;  %1123 = vst [vmem:[%s2079_s24 + $0x8] sm:$0xff] %v1115_v50  ;;  %v1130_v54 = vadd.f32 %v1115_v50, %v1114_v47  ;;  %v1148_v60 = vmul.f32 %v1115_v50, %v1115_v50 }
 0x236   : > { %v1053_v52 = vadd.f32 %v1052_v51, %v982_v46 }
 0x237   : > { %1131 = vadd.xlane.f32.xlu0 %v1130_v54  ;;  %v1155_v4 = vadd.f32 %v1148_v60, %v1147_v19 }
 0x238   : > { %v1116_v57 = vadd.f32 %v1102_v56, %v1053_v52  ;;  %v1081_v45 = vpop.f32.mrf.mxu3 }
 0x239   : > { %v1082_v59 = vadd.f32 %v1081_v45, %v1011_v48 }
 0x23a   : > { %1124 = vst [vmem:[%s2079_s24 + $0x10] sm:$0xff] %v1116_v57  ;;  %v1149_v49 = vmul.f32 %v1116_v57, %v1116_v57 }
 0x23b   : > { %v1117_v62 = vadd.f32 %v1102_v56, %v1082_v59 }
 0x23d   : > { %v1055_v63 = vpop.f32.mrf.mxu2  ;;  %1125 = vst [vmem:[%s2079_s24 + $0x18] sm:$0xff] %v1117_v62  ;;  %v1133_v39 = vadd.f32 %v1117_v62, %v1116_v57  ;;  %v1150_v7 = vmul.f32 %v1117_v62, %v1117_v62 }
 0x23e   : > { %v1056_v3 = vadd.f32 %v1055_v63, %v985_v58 }
 0x23f   : > { %1156 = vadd.xlane.f32.xlu0 %v1155_v4  ;;  %1134 = vadd.xlane.f32.xlu1 %v1133_v39  ;;  %v1158_v8 = vadd.f32 %v1150_v7, %v1149_v49 }
 0x240   : > { %v1118_v18 = vadd.f32 %v1107_v1, %v1056_v3  ;;  %v1084_v5 = vpop.f32.mrf.mxu3 }
 0x241   : > { %v1085_v6 = vadd.f32 %v1084_v5, %v1014_v2 }
 0x242   : > { %1126 = vst [vmem:[%s2079_s24 + $0x20] sm:$0xff] %v1118_v18  ;;  %v1151_v17 = vmul.f32 %v1118_v18, %v1118_v18 }
 0x243   : > { %v1119_v14 = vadd.f32 %v1107_v1, %v1085_v6 }
 0x245   : > { %v1058_v53 = vpop.f32.mrf.mxu2  ;;  %1127 = vst [vmem:[%s2079_s24 + $0x28] sm:$0xff] %v1119_v14  ;;  %v1136_v61 = vadd.f32 %v1119_v14, %v1118_v18  ;;  %v1152_v21 = vmul.f32 %v1119_v14, %v1119_v14 }
 0x246   : > { %v1059_v55 = vadd.f32 %v1058_v53, %v988_v42 }
 0x247   : > { %1159 = vadd.xlane.f32.xlu0 %v1158_v8  ;;  %1137 = vadd.xlane.f32.xlu2 %v1136_v61  ;;  %v1161_v24 = vadd.f32 %v1152_v21, %v1151_v17 }
 0x248   : > { %v1120_v11 = vadd.f32 %v1112_v9, %v1059_v55  ;;  %v1087_v22 = vpop.f32.mrf.mxu3 }
 0x249   : > { %v1088_v23 = vadd.f32 %v1087_v22, %v1017_v10 }
 0x24a   : > { %1128 = vst [vmem:[%s2079_s24 + $0x30] sm:$0xff] %v1120_v11 }
 0x24b   : > { %v1121_v27 = vadd.f32 %v1112_v9, %v1088_v23 }
 0x24d   : > { %1129 = vst [vmem:[%s2079_s24 + $0x38] sm:$0xff] %v1121_v27  ;;  %v1139_v12 = vadd.f32 %v1121_v27, %v1120_v11 }
 0x24f   : > { %1162 = vadd.xlane.f32.xlu0 %v1161_v24 }
 0x250   : > { %1576 = shalt.err (!%p1573_p5)
}
 0x251   : > { %s1630_s25 = smov 256   ;;  %s1631_s24 = smov 16   ;;  %v1153_v29 = vmul.f32 %v1120_v11, %v1120_v11  ;;  %v1154_v0 = vmul.f32 %v1121_v27, %v1121_v27  ;;  %vm1142_vm5 = vcmask 7168  }
 0x252   : > { %1472 = dma.vmem_to_hbm [thread:$0]  (%p1722_p4), %s1205_s15, 1024, %s1207_s16, %s1172_s18, %s1630_s25, %s1630_s25, %s1631_s24  }
 0x253   : > { %v1164_v26 = vadd.f32 %v1154_v0, %v1153_v29  ;;  %s1469_s1 = sshll.u32 %s1739_s23, 5 }
 0x254   : > { %s473_s20 = scalar_lea.vmem %s2151_s8, %s1469_s1  ;;  %s482_s12 = scalar_lea.vmem %s2152_s9, %s1469_s1 }
 0x257   : > { %1140 = vadd.xlane.f32.xlu0 %v1139_v12 }
 0x25f   : > { %1165 = vadd.xlane.f32.xlu0 %v1164_v26 }
 0x2aa   : > { %v1132_v30 = vpop.xlane.xlu0 %1131 }
 0x2ab   : > { %1143 = vst.msk [vmem:[%s473_s20] sm:$0xff] %vm1142_vm5, %v1132_v30 }
 0x2b2   : > { %v1157_v31 = vpop.xlane.xlu0 %1156  ;;  %v1135_v25 = vpop.xlane.xlu1 %1134 }
 0x2b3   : > { %1167 = vst.msk [vmem:[%s482_s12] sm:$0xff] %vm1142_vm5, %v1157_v31 }
 0x2b4   : > { %1144 = vst.msk [vmem:[%s473_s20 + $0x8] sm:$0xff] %vm1142_vm5, %v1135_v25 }
 0x2ba   : > { %v1160_v32 = vpop.xlane.xlu0 %1159  ;;  %v1138_v33 = vpop.xlane.xlu2 %1137 }
 0x2bb   : > { %1168 = vst.msk [vmem:[%s482_s12 + $0x8] sm:$0xff] %vm1142_vm5, %v1160_v32 }
 0x2bc   : > { %1145 = vst.msk [vmem:[%s473_s20 + $0x10] sm:$0xff] %vm1142_vm5, %v1138_v33 }
 0x2c2   : > { %v1163_v34 = vpop.xlane.xlu0 %1162 }
 0x2c3   : > { %1169 = vst.msk [vmem:[%s482_s12 + $0x10] sm:$0xff] %vm1142_vm5, %v1163_v34 }
 0x2ca   : > { %v1141_v35 = vpop.xlane.xlu0 %1140 }
 0x2cb   : > { %1146 = vst.msk [vmem:[%s473_s20 + $0x18] sm:$0xff] %vm1142_vm5, %v1141_v35 }
 0x2d2   : > { %v1166_v36 = vpop.xlane.xlu0 %1165 }
 0x2d3   : > { %1170 = vst.msk [vmem:[%s482_s12 + $0x18] sm:$0xff] %vm1142_vm5, %v1166_v36 }
 0x2d4 PF: > { %p1478_p4 = scmp.ge.s32.totalorder %s1627_s14, 2  ;;  %s1227_s19 = sand.u32 1, %s1607_s30  }
 0x2d5   : > { %s1228_s23 = scalar_lea.sflag [#allocation3], %s1227_s19 }
 0x2d6   : > { %p1475_p6 = pnand %p1478_p4, %p1729_p8 }
 0x2d8   : > { %p1476_p7 = pneg %p1475_p6 }
 0x2da   : > { %1602 = dma.done.wait (%p1476_p7), %s1228_s23, 1024  }
 0x2db   : > { %1604 = vsyncadd (%p1476_p7), %s1228_s23, 4294966272  ;;  %s23_s14 = sadd.s32 1, %s1627_s14   ;;  %s2171_s30 = smov %s1611_s10 }
 0x2dc   : > { %p20_p9 = scmp.ge.s32.totalorder %s23_s14, 4   ;;  %s2172_s10 = smov %s1615_s11 }
 0x2dd   : > { %s2173_s11 = smov %s1735_s22  ;;  %s2174_s12 = smov %s1623_s13 }
 0x2de   : > { %s2175_s13 = smov %s2177_s17  ;;  %22 = sbr.rel (!%p20_p9) target bundleno = 8 (0x8), region = 116 }
 0x2e3   :  { %1258 = vsyncpa [#allocation3], 1 }
 0x2e4   :  { %1260 = vsyncpa [#allocation3 + $0x1], 1 }

</bundles_post_ra>
